<compile_context>
chip_gen: v7x
topology: tpu7x:2x2x1
jax: 0.10.0
libtpu: 0.0.40
codegen_flags: <defaults>
</compile_context>

<pallas_src>
import jax
import jax.numpy as jnp
from jax.experimental import pallas as pl
from jax.experimental.pallas import tpu as pltpu


_TB_MAX = 1024  # max batch tile on the lane axis (multiple of 128)


# ----------------------------------------------------------------------------
# Pallas kernel: fused score gather + add + sigmoid for one batch tile.
# ----------------------------------------------------------------------------
def _ncf_kernel(idx_ref, su_ref, si_ref, out_ref):
    n_users = su_ref.shape[1]
    n_items = si_ref.shape[1]
    tb = idx_ref.shape[1]

    uidx = idx_ref[0:1, :]                                 # [1, TB] int32
    iidx = idx_ref[1:2, :]                                 # [1, TB] int32

    # One-hot gather masks: [vocab, TB] with batch on lanes.
    oh_u = (jax.lax.broadcasted_iota(jnp.int32, (n_users, tb), 0)
            == uidx).astype(jnp.float32)
    oh_i = (jax.lax.broadcasted_iota(jnp.int32, (n_items, tb), 0)
            == iidx).astype(jnp.float32)

    # Gather the pre-folded per-row scores via MXU:
    #   [1, vocab] @ [vocab, TB] -> [1, TB].  b_eff is already folded into
    #   the user scores, so logit = su[uidx] + si[iidx].
    logit = (jnp.dot(su_ref[...], oh_u, preferred_element_type=jnp.float32)
             + jnp.dot(si_ref[...], oh_i, preferred_element_type=jnp.float32))

    out_ref[...] = jax.nn.sigmoid(logit)                   # lane-dense store


# ----------------------------------------------------------------------------
# Wrapper: pick a lane-aligned batch tile and launch one kernel.
# ----------------------------------------------------------------------------
def neural_cf_late_cross_forward(sparse_feature, folded):
    if sparse_feature.ndim == 1:
        sparse_feature = sparse_feature[None, :]
    B = sparse_feature.shape[0]

    # Large tiles amortize per-grid-step overhead; cap at ceil(B/2) rounded up
    # to 128 so big batches split into >= 2 tiles (v7x has 2 TensorCores).
    half = -(-B // 2)
    tb = min(_TB_MAX, max(128, ((half + 127) // 128) * 128))
    n_tiles = pl.cdiv(B, tb)
    b_pad = n_tiles * tb

    idx = sparse_feature[:, :2].astype(jnp.int32).T         # [2, B]
    idx = jnp.pad(idx, ((0, 0), (0, b_pad - B)))             # [2, b_pad]

    su = folded["score_user_t"]                              # [1, n_users]
    si = folded["score_item_t"]                              # [1, n_items]
    n_users = su.shape[1]
    n_items = si.shape[1]

    out = pl.pallas_call(
        _ncf_kernel,
        out_shape=jax.ShapeDtypeStruct((1, b_pad), jnp.float32),
        grid=(n_tiles,),
        in_specs=[
            pl.BlockSpec((2, tb), lambda i: (0, i)),             # packed indices
            pl.BlockSpec((1, n_users), lambda i: (0, 0)),        # user scores (grid-invariant)
            pl.BlockSpec((1, n_items), lambda i: (0, 0)),        # item scores (grid-invariant)
        ],
        out_specs=pl.BlockSpec((1, tb), lambda i: (0, i)),
        compiler_params=pltpu.CompilerParams(
            dimension_semantics=("parallel",)),                  # megacore on v7x
    )(idx, su, si)

    return out[0, :B]                                            # matches .view(-1)


# ----------------------------------------------------------------------------
# Parameter construction (mirrors PyTorch __init__) + one-time inference fold.
# ----------------------------------------------------------------------------
def make_params(sparse_col_size, key):
    embedding_size = [int(6 * pow(c, 0.25)) for c in sparse_col_size]
    emb_u, emb_i = embedding_size[0], embedding_size[1]
    n_users, n_items = sparse_col_size[0], sparse_col_size[1]

    ks = jax.random.split(key, 12)
    f = jnp.float32

    def w(k, shape, scale=0.1):
        return (scale * jax.random.normal(k, shape)).astype(f)

    params = {
        "emb_user": w(ks[0], (n_users, emb_u)),
        "emb_item": w(ks[1], (n_items, emb_i)),
        # Linears stored as [in, out] (PyTorch weight transposed).
        "wu1": w(ks[2], (emb_u, 10)), "bu1": w(ks[3], (10,)),
        "wu2": w(ks[4], (10, 10)),    "bu2": w(ks[5], (10,)),
        "wi1": w(ks[6], (emb_i, 10)), "bi1": w(ks[7], (10,)),
        "wi2": w(ks[8], (10, 10)),    "bi2": w(ks[9], (10,)),
        "w3":  w(ks[10], (20, 1)),    "b3":  w(ks[11], (1,)),
    }
    return params, embedding_size


def fold_params(params):
    """One-time algebraic fold: towers + late cross -> per-row scalar scores."""
    w3u = params["w3"][:10, :]           # user half of the final weight
    w3i = params["w3"][10:, :]           # item half of the final weight

    wu_eff = params["wu1"] @ params["wu2"] @ w3u          # [emb_u, 1]
    wi_eff = params["wi1"] @ params["wi2"] @ w3i          # [emb_i, 1]
    b_eff = ((params["bu1"] @ params["wu2"] + params["bu2"]) @ w3u
             + (params["bi1"] @ params["wi2"] + params["bi2"]) @ w3i
             + params["b3"])                              # [1]

    # Fold the effective weight columns (and the scalar bias) into the tables:
    # one f32 score per embedding row, kept lane-dense as a [1, vocab] slab.
    score_user = params["emb_user"] @ wu_eff + b_eff      # [n_users, 1]
    score_item = params["emb_item"] @ wi_eff              # [n_items, 1]

    return {
        "score_user_t": jnp.asarray(score_user.T, jnp.float32),  # [1, n_users]
        "score_item_t": jnp.asarray(score_item.T, jnp.float32),  # [1, n_items]
    }


# ----------------------------------------------------------------------------
# Pure-JAX reference (unfolded, mirrors the PyTorch forward) for checking.
# ----------------------------------------------------------------------------
def reference_forward(sparse_feature, params):
    if sparse_feature.ndim == 1:
        sparse_feature = sparse_feature[None, :]
    ue = jnp.take(params["emb_user"], sparse_feature[:, 0], axis=0)
    ie = jnp.take(params["emb_item"], sparse_feature[:, 1], axis=0)
    u = ue @ params["wu1"] + params["bu1"]
    u = u @ params["wu2"] + params["bu2"]
    it = ie @ params["wi1"] + params["bi1"]
    it = it @ params["wi2"] + params["bi2"]
    cat = jnp.concatenate([u, it], axis=1)
    return jax.nn.sigmoid(cat @ params["w3"] + params["b3"]).reshape(-1)


if __name__ == "__main__":
    key = jax.random.PRNGKey(0)
    sparse_col_size = [100, 200]          # [num_users, num_items]
    params, emb_sizes = make_params(sparse_col_size, key)
    folded = fold_params(params)

    def make_batch(batch, seed):
        k_u, k_i = jax.random.split(jax.random.PRNGKey(seed), 2)
        user_ids = jax.random.randint(k_u, (batch,), 0, sparse_col_size[0])
        item_ids = jax.random.randint(k_i, (batch,), 0, sparse_col_size[1])
        return jnp.stack([user_ids, item_ids], axis=1).astype(jnp.int32)

    # Case 1: small batch (single 128-wide tile, padded lanes).
    sf_small = make_batch(8, 0)
    out_small = jax.block_until_ready(
        neural_cf_late_cross_forward(sf_small, folded))
    ref_small = reference_forward(sf_small, params)
    assert out_small.shape == (8,)
    assert jnp.allclose(out_small, ref_small, atol=1e-5, rtol=1e-5), (
        out_small, ref_small)

    # Case 2: batch spanning multiple grid tiles (exercises tiling + padding
    # and the >=2-tile split for v7x megacore).
    sf_multi = make_batch(300, 1)
    out_multi = jax.block_until_ready(
        neural_cf_late_cross_forward(sf_multi, folded))
    ref_multi = reference_forward(sf_multi, params)
    assert out_multi.shape == (300,)
    assert jnp.allclose(out_multi, ref_multi, atol=1e-5, rtol=1e-5)

    # Case 3: large batch hitting the 1024-wide tile cap.
    sf_big = make_batch(2500, 2)
    out_big = jax.block_until_ready(
        neural_cf_late_cross_forward(sf_big, folded))
    ref_big = reference_forward(sf_big, params)
    assert out_big.shape == (2500,)
    assert jnp.allclose(out_big, ref_big, atol=1e-5, rtol=1e-5)

    print("KERNEL_OK")
</pallas_src>

<mosaic_0001>
module attributes {stable_mosaic.version = 11 : i64} {
  func.func @_ncf_kernel(%arg0: i32, %arg1: memref<2x128xi32, #tpu.memory_space<vmem>>, %arg2: memref<1x100xf32, #tpu.memory_space<vmem>>, %arg3: memref<1x200xf32, #tpu.memory_space<vmem>>, %arg4: memref<1x128xf32, #tpu.memory_space<vmem>>) attributes {dimension_semantics = [#tpu.dimension_semantics<parallel>], iteration_bounds = array<i64: 1>, scalar_prefetch = 0 : i64, scratch_operands = 0 : i64, tpu.core_type = #tpu.core_type<tc>, window_params = [{transform_indices = @transform_0, window_bounds = array<i64: 2, 128>}, {pipeline_mode = #tpu.pipeline_mode<synchronous>, transform_indices = @transform_1, window_bounds = array<i64: 1, 100>}, {pipeline_mode = #tpu.pipeline_mode<synchronous>, transform_indices = @transform_2, window_bounds = array<i64: 1, 200>}, {transform_indices = @transform_3, window_bounds = array<i64: 1, 128>}]} {
    %c0 = arith.constant 0 : index
    %c0_0 = arith.constant 0 : index
    %0 = vector.load %arg1[%c0, %c0_0] : memref<2x128xi32, #tpu.memory_space<vmem>>, vector<1x128xi32>
    %c1 = arith.constant 1 : index
    %c0_1 = arith.constant 0 : index
    %1 = vector.load %arg1[%c1, %c0_1] : memref<2x128xi32, #tpu.memory_space<vmem>>, vector<1x128xi32>
    %2 = tpu.iota {dimensions = array<i32: 0>} : vector<100x128xi32>
    %3 = vector.broadcast %0 : vector<1x128xi32> to vector<100x128xi32>
    %4 = arith.cmpi eq, %2, %3 : vector<100x128xi32>
    %5 = arith.extui %4 : vector<100x128xi1> to vector<100x128xi32>
    %6 = arith.sitofp %5 : vector<100x128xi32> to vector<100x128xf32>
    %7 = tpu.iota {dimensions = array<i32: 0>} : vector<200x128xi32>
    %8 = vector.broadcast %1 : vector<1x128xi32> to vector<200x128xi32>
    %9 = arith.cmpi eq, %7, %8 : vector<200x128xi32>
    %10 = arith.extui %9 : vector<200x128xi1> to vector<200x128xi32>
    %11 = arith.sitofp %10 : vector<200x128xi32> to vector<200x128xf32>
    %c0_2 = arith.constant 0 : index
    %c0_3 = arith.constant 0 : index
    %12 = vector.load %arg2[%c0_2, %c0_3] : memref<1x100xf32, #tpu.memory_space<vmem>>, vector<1x100xf32>
    %cst = arith.constant dense<0.000000e+00> : vector<1x128xf32>
    %13 = tpu.matmul %12, %6, %cst {dimension_numbers = #tpu.dot_dimension_numbers<[1], [0], [0], [1], [0, 0, 1, 1], [], []>} : vector<1x100xf32>, vector<100x128xf32>, vector<1x128xf32> -> vector<1x128xf32>
    %c0_4 = arith.constant 0 : index
    %c0_5 = arith.constant 0 : index
    %14 = vector.load %arg3[%c0_4, %c0_5] : memref<1x200xf32, #tpu.memory_space<vmem>>, vector<1x200xf32>
    %cst_6 = arith.constant dense<0.000000e+00> : vector<1x128xf32>
    %15 = tpu.matmul %14, %11, %cst_6 {dimension_numbers = #tpu.dot_dimension_numbers<[1], [0], [0], [1], [0, 0, 1, 1], [], []>} : vector<1x200xf32>, vector<200x128xf32>, vector<1x128xf32> -> vector<1x128xf32>
    %16 = arith.addf %13, %15 : vector<1x128xf32>
    %17 = arith.negf %16 : vector<1x128xf32>
    %18 = math.exp %17 : vector<1x128xf32>
    %cst_7 = arith.constant 1.000000e+00 : f32
    %19 = vector.broadcast %cst_7 : f32 to vector<1x128xf32>
    %20 = arith.addf %19, %18 : vector<1x128xf32>
    %21 = arith.divf %19, %20 : vector<1x128xf32>
    %c0_8 = arith.constant 0 : index
    %c0_9 = arith.constant 0 : index
    %22 = vector.load %arg4[%c0_8, %c0_9] : memref<1x128xf32, #tpu.memory_space<vmem>>, vector<1x128xf32>
    tpu.vector_store %arg4[%c0_8, %c0_9], %21 {strides = array<i32>} : memref<1x128xf32, #tpu.memory_space<vmem>>, vector<1x128xf32>,
    return
  }
  func.func @transform_0(%arg0: i32) -> (i32, i32) {
    %c0_i32 = arith.constant 0 : i32
    %c0_i32_0 = arith.constant 0 : i32
    return %c0_i32, %arg0 : i32, i32
  }
  func.func @transform_1(%arg0: i32) -> (i32, i32) {
    %c0_i32 = arith.constant 0 : i32
    %c0_i32_0 = arith.constant 0 : i32
    %c0_i32_1 = arith.constant 0 : i32
    return %c0_i32, %c0_i32_0 : i32, i32
  }
  func.func @transform_2(%arg0: i32) -> (i32, i32) {
    %c0_i32 = arith.constant 0 : i32
    %c0_i32_0 = arith.constant 0 : i32
    %c0_i32_1 = arith.constant 0 : i32
    return %c0_i32, %c0_i32_0 : i32, i32
  }
  func.func @transform_3(%arg0: i32) -> (i32, i32) {
    %c0_i32 = arith.constant 0 : i32
    %c0_i32_0 = arith.constant 0 : i32
    return %c0_i32, %arg0 : i32, i32
  }
}

</mosaic_0001>

<bundles_post_ra>
// kernel: tpu_custom_call.1
= control target key start
LH: loop header
LB: loop body
LE: loop exit
PB: predicated region body
PF: predicated region fallthrough
CT: control target
= control target key end

     0   :  { %8 = vsyncpa [#allocation3], 0  ;;  %s773_s0 = inlined_call_operand.hbm [shape: s32[2,128], index: 0, kind: input, shape index: {}]   ;;  %s774_s1 = inlined_call_operand.vmem [shape: f32[1,100], index: 1, kind: input, shape index: {}]   ;;  %s775_s2 = inlined_call_operand.vmem [shape: f32[1,200], index: 2, kind: input, shape index: {}]   ;;  %s776_s3 = inlined_call_operand.hbm [shape: f32[1,128], index: 3, kind: output, shape index: {}]  }
   0x1   :  { %9 = vsyncpa [#allocation4], 0  ;;  %s600_s12 = smov [#allocation2]   ;;  %s552_s16 = scalar_lea.hbm %s773_s0, 32 }
   0x2   :  { %s16_s13 = sshll.u32 %s600_s12, 4  ;;  %p553_p0 = scmp.ne.s32.totalorder %s773_s0, %s552_s16  ;;  %s17_s13 = int_to_ptr.vmem [resolvable:$true] %s16_s13 }
   0x3   :  { %p556_p1 = scmp.lt.u32.totalorder %s552_s16, %s773_s0 }
   0x5   :  { %p558_p2 = pnand %p556_p1, %p553_p0 }
   0x7   :  { %561 = shalt.err (!%p558_p2)
}
   0x8   :  { %s562_s21 = scalar_lea.vmem %s17_s13, 32  ;;  %p567_p4 = scmp.lt.s32.totalorder %s17_s13, %s17_s13 }
   0x9   :  { %p563_p3 = scmp.ne.s32.totalorder %s17_s13, %s562_s21  ;;  %p568_p5 = scmp.lt.s32.totalorder %s562_s21, %s562_s21 }
   0xb   :  { %p569_p6 = por %p568_p5, %p567_p4 }
   0xd   :  { %p570_p7 = pnand %p569_p6, %p563_p3 }
   0xf   :  { %573 = shalt.err (!%p570_p7)
}
  0x10   :  { %19 = dma.hbm_to_vmem [thread:$0]  %s773_s0, 32, %s17_s13, [#allocation3]  }
  0x11   :  { %596 = dma.done.wait [#allocation3], 32  }
  0x12   :  { %597 = vsyncadd [#allocation3], 4294967264  ;;  %v29_v0 = vlaneseq  ;;  %v601_v1 = vmov 0.0|0.0   ;;  %vm602_vm0 = vmmov 0   ;;  %v603_v3 = vmov 0.0  }
  0x13   :  { %486 = vmatprep.subr.bf16.mxu1 %v601_v1  ;;  %522 = vmatprep.subr.bf16.mxu0 %v601_v1  ;;  %v647_v7 = vld [vmem:[#allocation2 + $0x1] ss:$0 sm:$0xff]  ;;  %v656_v10 = vld [vmem:[#allocation2] ss:$0 sm:$0xff]  ;;  %v604_v11 = vmov 1.0|1.0  }
  0x14   :  { %v641_v2 = vshrl.u32 %v29_v0, 7  ;;  %483 = vmatprep.mubr.msk.f32.mxu0 %vm602_vm0, %v603_v3  ;;  %v685_v17 = vld [vmem:[%s775_s2] sm:$0x3]  ;;  %v605_v38 = vmov 1.0  }
  0x15   :  { %v177_v30 = vld [vmem:[%s774_s1] sm:$0x1]  ;;  %s606_s1 = smov [#allocation5]  }
  0x16   :  { %v31_v4 = vadd.s32 8, %v641_v2  ;;  %v32_v5 = vadd.s32 16, %v641_v2  ;;  %v33_v6 = vadd.s32 24, %v641_v2  ;;  %v34_v8 = vadd.s32 32, %v641_v2  ;;  %s353_s26 = sshll.u32 %s606_s1, 4  ;;  %s354_s26 = int_to_ptr.vmem [resolvable:$true] %s353_s26 }
  0x17   :  { %v35_v9 = vadd.s32 40, %v641_v2  ;;  %vm102_vm1 = vcmp.eq.s32.totalorder %v641_v2, %v647_v7  ;;  %v36_v12 = vadd.s32 48, %v641_v2  ;;  %v37_v13 = vadd.s32 56, %v641_v2  ;;  %s574_s27 = scalar_lea.vmem %s354_s26, 16  ;;  %s578_s28 = scalar_lea.vmem %s354_s26, 32 }
  0x18   :  { %vm103_vm2 = vcmp.eq.s32.totalorder %v31_v4, %v647_v7  ;;  %vm104_vm3 = vcmp.eq.s32.totalorder %v32_v5, %v647_v7  ;;  %vm105_vm4 = vcmp.eq.s32.totalorder %v33_v6, %v647_v7  ;;  %vm106_vm7 = vcmp.eq.s32.totalorder %v34_v8, %v647_v7  ;;  %p575_p8 = scmp.ne.s32.totalorder %s354_s26, %s574_s27  ;;  %p579_p9 = scmp.lt.s32.totalorder %s354_s26, %s354_s26 }
  0x19   :  { %vm487_vm5 = vmpackc.low %vm103_vm2, %vm102_vm1  ;;  %vm107_vm8 = vcmp.eq.s32.totalorder %v35_v9, %v647_v7  ;;  %vm47_vm9 = vcmp.eq.s32.totalorder %v641_v2, %v656_v10  ;;  %vm48_vm10 = vcmp.eq.s32.totalorder %v31_v4, %v656_v10  ;;  %vm49_vm12 = vcmp.eq.s32.totalorder %v32_v5, %v656_v10  ;;  %p580_p10 = scmp.lt.s32.totalorder %s578_s28, %s574_s27 }
  0x1a   :  { %488 = vmatpush1.bf16.msk.msra.mxu1 %vm487_vm5, %v604_v11  ;;  %vm490_vm6 = vmpackc.low %vm105_vm4, %vm104_vm3  ;;  %vm50_vm13 = vcmp.eq.s32.totalorder %v33_v6, %v656_v10  ;;  %vm108_vm15 = vcmp.eq.s32.totalorder %v36_v12, %v647_v7  ;;  %vm109_vm0 = vcmp.eq.s32.totalorder %v37_v13, %v647_v7  ;;  %v38_v14 = vadd.s32 64, %v641_v2 }
  0x1b   :  { %489 = vmatprep.subr.bf16.mxu1 %v601_v1  ;;  %vm493_vm11 = vmpackc.low %vm107_vm8, %vm106_vm7  ;;  %v39_v15 = vadd.s32 72, %v641_v2  ;;  %vm51_vm2 = vcmp.eq.s32.totalorder %v34_v8, %v656_v10  ;;  %vm52_vm3 = vcmp.eq.s32.totalorder %v35_v9, %v656_v10  ;;  %v40_v16 = vadd.s32 80, %v641_v2  ;;  %p581_p11 = por %p580_p10, %p579_p9 }
  0x1c   :  { %vm523_vm14 = vmpackc.low %vm48_vm10, %vm47_vm9  ;;  %vm110_vm5 = vcmp.eq.s32.totalorder %v38_v14, %v647_v7  ;;  %v41_v18 = vadd.s32 88, %v641_v2  ;;  %v186_v19 = vsub.s32 1, %v641_v2  ;;  %vm189_vm8 = vcmask 588800  }
  0x1d   :  { %524 = vmatpush3.bf16.msk.msra.mxu0 %vm523_vm14, %v604_v11  ;;  %vm526_vm1 = vmpackc.low %vm50_vm13, %vm49_vm12  ;;  %vm53_vm9 = vcmp.eq.s32.totalorder %v36_v12, %v656_v10  ;;  %vm54_vm10 = vcmp.eq.s32.totalorder %v37_v13, %v656_v10  ;;  %vm112_vm12 = vcmp.eq.s32.totalorder %v40_v16, %v647_v7  ;;  %v42_v21 = vadd.s32 96, %v641_v2  ;;  %p582_p12 = pnand %p581_p11, %p575_p8 }
  0x1e   :  { %491 = vmatpush1.bf16.msk.msra.mxu1 %vm490_vm6, %v604_v11  ;;  %525 = vmatprep.subr.bf16.mxu0 %v601_v1  ;;  %vm496_vm4 = vmpackc.low %vm109_vm0, %vm108_vm15  ;;  %vm111_vm6 = vcmp.eq.s32.totalorder %v39_v15, %v647_v7  ;;  %v187_v20 = vrot.slane %v685_v17, %v186_v19  ;;  %vm113_vm13 = vcmp.eq.s32.totalorder %v41_v18, %v647_v7  ;;  %v86_v22 = vadd.s32 104, %v641_v2 }
  0x1f   :  { %492 = vmatprep.subr.bf16.mxu1 %v601_v1  ;;  %vm529_vm7 = vmpackc.low %vm52_vm3, %vm51_vm2  ;;  %vm55_vm15 = vcmp.eq.s32.totalorder %v38_v14, %v656_v10  ;;  %vm56_vm0 = vcmp.eq.s32.totalorder %v39_v15, %v656_v10  ;;  %vm114_vm2 = vcmp.eq.s32.totalorder %v42_v21, %v647_v7  ;;  %v87_v23 = vadd.s32 112, %v641_v2 }
  0x20   :  { %427 = vmatprep.mubr.msk.f32.mxu1 %vm189_vm8, %v187_v20  ;;  %vm532_vm14 = vmpackc.low %vm54_vm10, %vm53_vm9  ;;  %vm115_vm3 = vcmp.eq.s32.totalorder %v86_v22, %v647_v7  ;;  %v88_v24 = vadd.s32 120, %v641_v2  ;;  %v89_v25 = vadd.s32 128, %v641_v2  ;;  %v90_v26 = vadd.s32 136, %v641_v2 }
  0x21   :  { %527 = vmatpush3.bf16.msk.msra.mxu0 %vm526_vm1, %v604_v11  ;;  %vm502_vm1 = vmpackc.low %vm113_vm13, %vm112_vm12  ;;  %vm116_vm8 = vcmp.eq.s32.totalorder %v87_v23, %v647_v7  ;;  %v91_v27 = vadd.s32 144, %v641_v2  ;;  %v92_v28 = vadd.s32 152, %v641_v2  ;;  %v93_v31 = vadd.s32 160, %v641_v2 }
  0x22   :  { %494 = vmatpush1.bf16.msk.msra.mxu1 %vm493_vm11, %v604_v11  ;;  %528 = vmatprep.subr.bf16.mxu0 %v601_v1  ;;  %vm499_vm11 = vmpackc.low %vm111_vm6, %vm110_vm5  ;;  %vm57_vm5 = vcmp.eq.s32.totalorder %v40_v16, %v656_v10  ;;  %vm58_vm6 = vcmp.eq.s32.totalorder %v41_v18, %v656_v10  ;;  %vm117_vm9 = vcmp.eq.s32.totalorder %v88_v24, %v647_v7  ;;  %v94_v32 = vadd.s32 168, %v641_v2 }
  0x23   :  { %495 = vmatprep.subr.bf16.mxu1 %v601_v1  ;;  %vm538_vm10 = vmpackc.low %vm58_vm6, %vm57_vm5  ;;  %vm118_vm13 = vcmp.eq.s32.totalorder %v89_v25, %v647_v7  ;;  %vm122_vm5 = vcmp.eq.s32.totalorder %v93_v31, %v647_v7  ;;  %v95_v33 = vadd.s32 176, %v641_v2  ;;  %v96_v34 = vadd.s32 184, %v641_v2 }
  0x24   :  { %vm508_vm12 = vmpackc.low %vm117_vm9, %vm116_vm8  ;;  %vm123_vm6 = vcmp.eq.s32.totalorder %v94_v32, %v647_v7  ;;  %v97_v35 = vadd.s32 192, %v641_v2  ;;  %v182_v36 = vsub.s32 0, %v641_v2 }
  0x25   :  { %530 = vmatpush3.bf16.msk.msra.mxu0 %vm529_vm7, %v604_v11  ;;  %vm505_vm7 = vmpackc.low %vm115_vm3, %vm114_vm2  ;;  %vm120_vm2 = vcmp.eq.s32.totalorder %v91_v27, %v647_v7  ;;  %vm121_vm3 = vcmp.eq.s32.totalorder %v92_v28, %v647_v7  ;;  %vm124_vm8 = vcmp.eq.s32.totalorder %v95_v33, %v647_v7  ;;  %vm125_vm9 = vcmp.eq.s32.totalorder %v96_v34, %v647_v7 }
  0x26   :  { %497 = vmatpush1.bf16.msk.msra.mxu1 %vm496_vm4, %v604_v11  ;;  %531 = vmatprep.subr.bf16.mxu0 %v601_v1  ;;  %vm535_vm4 = vmpackc.low %vm56_vm0, %vm55_vm15  ;;  %vm266_vm15 = vcmask 1043456   ;;  %vm262_vm0 = vcmask 818176   ;;  %v183_v37 = vrot.slane %v685_v17, %v182_v36 }
  0x27   :  { %498 = vmatprep.subr.bf16.mxu1 %v601_v1 }
  0x29   :  { %533 = vmatpush3.bf16.msk.msra.mxu0 %vm532_vm14, %v604_v11  ;;  %vm119_vm14 = vcmp.eq.s32.totalorder %v90_v26, %v647_v7 }
  0x2a   :  { %500 = vmatpush1.bf16.msk.msra.mxu1 %vm499_vm11, %v604_v11  ;;  %534 = vmatprep.subr.bf16.mxu0 %v601_v1  ;;  %vm59_vm11 = vcmp.eq.s32.totalorder %v42_v21, %v656_v10 }
  0x2b   :  { %501 = vmatprep.subr.bf16.mxu1 %v601_v1  ;;  %v375_v29 = vsel %vm59_vm11, 1.0, %v603_v3  ;;  %vm126_vm11 = vcmp.eq.s32.totalorder %v97_v35, %v647_v7 }
  0x2d   :  { %536 = vmatpush3.bf16.msk.msra.mxu0 %vm535_vm4, %v604_v11  ;;  %vm514_vm4 = vmpackc.low %vm121_vm3, %vm120_vm2 }
  0x2e   :  { %503 = vmatpush1.bf16.msk.msra.mxu1 %vm502_vm1, %v604_v11  ;;  %537 = vmatprep.subr.bf16.mxu0 %v601_v1  ;;  %vm511_vm1 = vmpackc.low %vm119_vm14, %vm118_vm13 }
  0x2f   :  { %504 = vmatprep.subr.bf16.mxu1 %v601_v1 }
  0x31   :  { %539 = vmatpush3.bf16.msk.msra.mxu0 %vm538_vm10, %v604_v11  ;;  %vm520_vm10 = vmpackc.low %vm125_vm9, %vm124_vm8 }
  0x32   :  { %506 = vmatpush1.bf16.msk.msra.mxu1 %vm505_vm7, %v604_v11  ;;  %481 = vmatprep.subr.mxu0 %v603_v3  ;;  %vm517_vm7 = vmpackc.low %vm123_vm6, %vm122_vm5 }
  0x33   :  { %507 = vmatprep.subr.bf16.mxu1 %v601_v1 }
  0x35   :  { %482 = vmatpush3.msk.msra.mxu0 %vm266_vm15, %v375_v29 }
  0x36   :  { %509 = vmatpush1.bf16.msk.msra.mxu1 %vm508_vm12, %v604_v11  ;;  %484 = vmatmul.mubr.msk.f32.vlgmr.msra.gmra.mrb[0].mxu0 %vm262_vm0, %v177_v30 }
  0x37   :  { %510 = vmatprep.subr.bf16.mxu1 %v601_v1 }
  0x3a   :  { %512 = vmatpush1.bf16.msk.msra.mxu1 %vm511_vm1, %v604_v11 }
  0x3b   :  { %513 = vmatprep.subr.bf16.mxu1 %v601_v1 }
  0x3e   :  { %515 = vmatpush1.bf16.msk.msra.mxu1 %vm514_vm4, %v604_v11 }
  0x3f   :  { %516 = vmatprep.subr.bf16.mxu1 %v601_v1 }
  0x42   :  { %518 = vmatpush1.bf16.msk.msra.mxu1 %vm517_vm7, %v604_v11 }
  0x43   :  { %519 = vmatprep.subr.bf16.mxu1 %v601_v1 }
  0x46   :  { %521 = vmatpush1.bf16.msk.msra.mxu1 %vm520_vm10, %v604_v11 }
  0x47   :  { %240 = vmatprep.subr.mxu1 %v603_v3 }
  0x4a   :  { %426 = vmatpush1.msk.msra.mxu1 %vm126_vm11, %v605_v38 }
  0x4b   :  { %257 = vmatmul.mubr.f32.vlgmr.msra.gmra.mrb[0].mxu1 %v183_v37 }
 0x109   :  { %v336_v39 = vpop.f32.mrb[0].mxu0 }
 0x10a   :  { %v485_v40 = vpop.f32.mrb[1].mxu0 }
 0x11e   :  { %v258_v41 = vpop.f32.mrb[0].mxu1 }
 0x11f   :  { %v337_v42 = vadd.f32 %v336_v39, %v258_v41  ;;  %v260_v43 = vpop.f32.mrb[1].mxu1 }
 0x121   :  { %v442_v44 = vmul.f32 -1.442695, %v337_v42 }
 0x123   :  { %548 = vpow2.f32 %v442_v44 }
 0x12d   :  { %v549_v45 = vpop.eup %548 }
 0x12e   :  { %v343_v46 = vadd.f32 1.0, %v549_v45 }
 0x130   :  { %550 = vrcp.f32 %v343_v46 }
 0x13a   :  { %v551_v47 = vpop.eup %550 }
 0x13b   :  { %346 = vst [vmem:[#allocation5] sm:$0x1] %v551_v47 }
 0x13c   :  { %585 = shalt.err (!%p582_p12)
}
 0x13d   :  { %s586_s4 = scalar_lea.hbm %s776_s3, 16 }
 0x13e   :  { %p587_p13 = scmp.ne.s32.totalorder %s776_s3, %s586_s4  ;;  %p590_p0 = scmp.lt.u32.totalorder %s586_s4, %s776_s3 }
 0x140   :  { %p592_p1 = pnand %p590_p0, %p587_p13 }
 0x142   :  { %595 = shalt.err (!%p592_p1)
}
 0x143   :  { %356 = dma.vmem_to_hbm [thread:$0]  %s354_s26, 16, %s776_s3, [#allocation4]  }
 0x144   :  { %598 = dma.done.wait [#allocation4], 16  }
 0x145   :  { %599 = vsyncadd [#allocation4], 4294967280 }
 0x146   :  { %360 = vsyncpa [#allocation3], 1 }
 0x147   :  { %361 = vsyncpa [#allocation4], 1 }

</bundles_post_ra>
